<compile_context>
chip_gen: v7x
topology: tpu7x:2x2x1
jax: 0.10.0
libtpu: 0.0.40
codegen_flags: <defaults>
</compile_context>

<pallas_src>
import jax
import jax.numpy as jnp
from jax.experimental import pallas as pl
from jax.experimental.pallas import tpu as pltpu


def _round_up(x, m):
    return ((x + m - 1) // m) * m


def _vmem_capacity_bytes():
    """Per-core VMEM capacity; conservative 64 MiB fallback (v7x) if unknown."""
    try:
        cap = int(pltpu.get_tpu_info().vmem_capacity_bytes)
        if cap > 0:
            return cap
    except Exception:
        pass
    return 64 * 1024 * 1024


# ---------------------------------------------------------------------------
# Stage 1: linear projection  seq_fts = seq @ W^T   (nn.Linear, bias=False)
# ---------------------------------------------------------------------------
def _linear_kernel(seq_ref, wT_ref, fts_ref):
    # seq_ref: (TM, IN_pad)   wT_ref: (IN_pad, OUT_pad)   fts_ref: (TM, OUT_pad)
    fts_ref[...] = jnp.dot(
        seq_ref[...], wT_ref[...], preferred_element_type=jnp.float32
    ).astype(fts_ref.dtype)


# ---------------------------------------------------------------------------
# Stage 2: tiled aggregation  out = PReLU(adj @ seq_fts + bias)
# ---------------------------------------------------------------------------
def _make_agg_kernel(resident_tk=None):
    """resident_tk=None: fts_ref is the (TK, OUT_pad) block for this k step.
    resident_tk=TK:     fts_ref is the full (N_pad, OUT_pad) per-batch slab
                        kept resident in VMEM; slice the k-th chunk locally."""

    def kernel(alpha_ref, adj_ref, fts_ref, bias_ref, out_ref):
        k = pl.program_id(2)

        @pl.when(k == 0)
        def _():
            out_ref[...] = jnp.zeros_like(out_ref)

        if resident_tk is None:
            fts = fts_ref[...]
        else:
            start = pl.multiple_of(k * resident_tk, resident_tk)
            fts = fts_ref[pl.ds(start, resident_tk), :]

        # f32 accumulation directly into the f32 output block (VMEM-resident
        # across the reduction axis: out index_map ignores k).
        out_ref[...] += jnp.dot(adj_ref[...], fts,
                                preferred_element_type=jnp.float32)

        @pl.when(k == pl.num_programs(2) - 1)
        def _():
            o = out_ref[...] + bias_ref[...]
            alpha = alpha_ref[0, 0]
            out_ref[...] = jnp.where(o > 0.0, o, alpha * o)

    return kernel


def gcn_forward(seq, adj, weight, bias, alpha, *, agg_dtype=jnp.bfloat16):
    """DGI GCN forward: PReLU(bmm(adj, seq @ W^T) + bias).

    seq   : (B, N, IN)  f32
    adj   : (B, N, N)   f32 (dense)
    weight: (OUT, IN)   f32
    bias  : (OUT,)      f32
    alpha : scalar f32 (PReLU shared parameter)
    agg_dtype: dtype of the adj / seq_fts MXU operands in the aggregation.
               Default bf16 -- the MXU is natively bf16 on v5e/v6e/v7x, so this
               halves adjacency HBM traffic and avoids multi-pass f32 matmuls
               on every generation; accumulation stays f32 either way. Pass
               jnp.float32 for a bit-accurate (slower) path.
    Returns (B, N, OUT) f32.
    """
    B, N, IN = seq.shape
    OUT = weight.shape[0]

    # Lane-dense feature dims: pad IN and OUT to multiples of 128.
    OUT_pad = _round_up(OUT, 128)
    IN_pad = _round_up(IN, 128)

    # Row / reduction tiles for the N x N aggregation (always lane-dense).
    n128 = _round_up(N, 128)
    if n128 <= 1024:
        TM = TK = N_pad = n128          # single tile over nodes (small graphs)
    else:
        TM = TK = 512                   # multiples of 256 keep the MXU full
        N_pad = _round_up(N, 512)

    itemsize = jnp.dtype(agg_dtype).itemsize
    vmem_cap = _vmem_capacity_bytes()

    # Zero-pad once at the XLA level. Padded adj columns are zero, so padded
    # seq_fts rows never contribute; padded output rows/cols are sliced away.
    seq_p = jnp.pad(seq, ((0, 0), (0, N_pad - N), (0, IN_pad - IN)))
    adj_p = jnp.pad(adj, ((0, 0), (0, N_pad - N), (0, N_pad - N))).astype(agg_dtype)
    wT_p = jnp.pad(weight.T, ((0, IN_pad - IN), (0, OUT_pad - OUT)))  # (IN_pad, OUT_pad)
    bias_p = jnp.pad(bias, (0, OUT_pad - OUT)).reshape(1, OUT_pad)
    alpha2d = jnp.asarray(alpha, jnp.float32).reshape(1, 1)

    # ---- Stage 1: linear projection (hoisted out of the aggregation loop) ----
    stage1_bytes = (2 * TM * IN_pad * 4          # seq tile, double-buffered
                    + 2 * IN_pad * OUT_pad * 4   # weights
                    + 2 * TM * OUT_pad * itemsize)
    stage1_vmem = int(min(vmem_cap - 2 * 1024 * 1024,
                          max(32 * 1024 * 1024, stage1_bytes + 8 * 1024 * 1024)))

    seq_fts = pl.pallas_call(
        _linear_kernel,
        out_shape=jax.ShapeDtypeStruct((B, N_pad, OUT_pad), agg_dtype),
        grid_spec=pltpu.PrefetchScalarGridSpec(
            num_scalar_prefetch=0,
            grid=(B, N_pad // TM),
            in_specs=[
                pl.BlockSpec((pl.Squeezed(), TM, IN_pad), lambda b, i: (b, i, 0)),
                pl.BlockSpec((IN_pad, OUT_pad), lambda b, i: (0, 0)),
            ],
            out_specs=pl.BlockSpec((pl.Squeezed(), TM, OUT_pad),
                                   lambda b, i: (b, i, 0)),
        ),
        compiler_params=pltpu.CompilerParams(
            dimension_semantics=("parallel", "parallel"),
            vmem_limit_bytes=stage1_vmem),
    )(seq_p, wT_p)

    # ---- Stage 2: tiled adj @ seq_fts with fused bias + PReLU epilogue ----
    n_row_tiles = N_pad // TM
    n_k_tiles = N_pad // TK

    common_bytes = (2 * TM * TK * itemsize       # adj tile, double-buffered
                    + 2 * TM * OUT_pad * 4       # f32 output block
                    + 2 * OUT_pad * 4)           # bias
    resident_bytes = common_bytes + 2 * N_pad * OUT_pad * itemsize
    streamed_bytes = common_bytes + 2 * TK * OUT_pad * itemsize

    # Keep the whole per-batch seq_fts VMEM-resident when it fits with
    # headroom (gates cleanly on v7x's 64 MiB per-core VMEM; always true for
    # the streamed fallback on v5e/v6e's 128 MiB).
    use_resident = (n_k_tiles > 1) and (resident_bytes <= vmem_cap - 12 * 1024 * 1024)

    if use_resident:
        fts_spec = pl.BlockSpec((pl.Squeezed(), N_pad, OUT_pad),
                                lambda b, i, k: (b, 0, 0))   # re-DMA only on batch change
        agg_kernel = _make_agg_kernel(resident_tk=TK)
        tile_bytes = resident_bytes
    else:
        fts_spec = pl.BlockSpec((pl.Squeezed(), TK, OUT_pad),
                                lambda b, i, k: (b, k, 0))
        agg_kernel = _make_agg_kernel(resident_tk=None)
        tile_bytes = streamed_bytes

    stage2_vmem = int(min(vmem_cap - 2 * 1024 * 1024,
                          max(32 * 1024 * 1024, tile_bytes + 8 * 1024 * 1024)))

    out_p = pl.pallas_call(
        agg_kernel,
        out_shape=jax.ShapeDtypeStruct((B, N_pad, OUT_pad), jnp.float32),
        grid_spec=pltpu.PrefetchScalarGridSpec(
            num_scalar_prefetch=0,
            grid=(B, n_row_tiles, n_k_tiles),
            in_specs=[
                pl.BlockSpec(memory_space=pltpu.MemorySpace.SMEM),          # alpha
                pl.BlockSpec((pl.Squeezed(), TM, TK), lambda b, i, k: (b, i, k)),
                fts_spec,                                                   # seq_fts
                pl.BlockSpec((1, OUT_pad), lambda b, i, k: (0, 0)),         # bias
            ],
            out_specs=pl.BlockSpec((pl.Squeezed(), TM, OUT_pad),
                                   lambda b, i, k: (b, i, 0)),
        ),
        compiler_params=pltpu.CompilerParams(
            dimension_semantics=("parallel", "parallel", "arbitrary"),
            vmem_limit_bytes=stage2_vmem),
    )(alpha2d, adj_p, seq_fts, bias_p)

    return out_p[:, :N, :OUT]


if __name__ == "__main__":
    # Small deterministic shapes consistent with the GCN forward.
    B, N, IN, OUT = 2, 16, 8, 32

    key = jax.random.PRNGKey(0)
    k_seq, k_adj, k_w = jax.random.split(key, 3)

    seq = jax.random.normal(k_seq, (B, N, IN), dtype=jnp.float32)
    a = jax.random.uniform(k_adj, (B, N, N), dtype=jnp.float32)
    adj = (a + jnp.swapaxes(a, 1, 2)) * 0.5                    # symmetric dense adj

    # Xavier-uniform Linear weight (out_ft, in_ft); bias filled with 0.
    bound = (6.0 / (IN + OUT)) ** 0.5
    weight = jax.random.uniform(k_w, (OUT, IN), minval=-bound, maxval=bound,
                                dtype=jnp.float32)
    bias = jnp.zeros((OUT,), dtype=jnp.float32)
    alpha = jnp.float32(0.25)                                  # PReLU default init

    # Reference in plain JAX (f32, highest matmul precision).
    hp = jax.lax.Precision.HIGHEST
    ref = jnp.einsum("bni,oi->bno", seq, weight, precision=hp)
    ref = jnp.einsum("bnm,bmf->bnf", adj, ref, precision=hp)
    ref = ref + bias
    ref = jnp.where(ref > 0, ref, alpha * ref)

    # Default bf16-operand path (f32 accumulation).
    out = gcn_forward(seq, adj, weight, bias, alpha)
    jax.block_until_ready(out)
    assert out.shape == (B, N, OUT)
    assert jnp.allclose(out, ref, atol=5e-2, rtol=5e-2)

    # f32-operand path, tighter tolerance.
    out_f32 = gcn_forward(seq, adj, weight, bias, alpha, agg_dtype=jnp.float32)
    jax.block_until_ready(out_f32)
    assert jnp.allclose(out_f32, ref, atol=1e-3, rtol=1e-3)

    print("KERNEL_OK")
</pallas_src>

<mosaic_0001>
module attributes {stable_mosaic.version = 11 : i64} {
  func.func @_linear_kernel(%arg0: i32, %arg1: i32, %arg2: memref<1x128x128xf32, #tpu.memory_space<vmem>>, %arg3: memref<128x128xf32, #tpu.memory_space<vmem>>, %arg4: memref<1x128x128xbf16, #tpu.memory_space<vmem>>) attributes {dimension_semantics = [#tpu.dimension_semantics<parallel>, #tpu.dimension_semantics<parallel>], iteration_bounds = array<i64: 2, 1>, scalar_prefetch = 0 : i64, scratch_operands = 0 : i64, tpu.core_type = #tpu.core_type<tc>, window_params = [{transform_indices = @transform_0, window_bounds = array<i64: 1, 128, 128>}, {pipeline_mode = #tpu.pipeline_mode<synchronous>, transform_indices = @transform_1, window_bounds = array<i64: 128, 128>}, {transform_indices = @transform_2, window_bounds = array<i64: 1, 128, 128>}]} {
    %c0 = arith.constant 0 : index
    %c0_0 = arith.constant 0 : index
    %c0_1 = arith.constant 0 : index
    %0 = vector.load %arg2[%c0, %c0_0, %c0_1] : memref<1x128x128xf32, #tpu.memory_space<vmem>>, vector<1x128x128xf32>
    %1 = vector.shape_cast %0 : vector<1x128x128xf32> to vector<128x128xf32>
    %c0_2 = arith.constant 0 : index
    %c0_3 = arith.constant 0 : index
    %2 = vector.load %arg3[%c0_2, %c0_3] : memref<128x128xf32, #tpu.memory_space<vmem>>, vector<128x128xf32>
    %cst = arith.constant dense<0.000000e+00> : vector<128x128xf32>
    %3 = tpu.matmul %1, %2, %cst {dimension_numbers = #tpu.dot_dimension_numbers<[1], [0], [0], [1], [0, 0, 1, 1], [], []>} : vector<128x128xf32>, vector<128x128xf32>, vector<128x128xf32> -> vector<128x128xf32>
    %4 = arith.truncf %3 : vector<128x128xf32> to vector<128x128xbf16>
    %c0_4 = arith.constant 0 : index
    %c0_5 = arith.constant 0 : index
    %c0_6 = arith.constant 0 : index
    %5 = vector.load %arg4[%c0_4, %c0_5, %c0_6] : memref<1x128x128xbf16, #tpu.memory_space<vmem>>, vector<1x128x128xbf16>
    %6 = vector.shape_cast %5 : vector<1x128x128xbf16> to vector<128x128xbf16>
    %7 = vector.shape_cast %4 : vector<128x128xbf16> to vector<1x128x128xbf16>
    tpu.vector_store %arg4[%c0_4, %c0_5, %c0_6], %7 {strides = array<i32>} : memref<1x128x128xbf16, #tpu.memory_space<vmem>>, vector<1x128x128xbf16>,
    return
  }
  func.func @transform_0(%arg0: i32, %arg1: i32) -> (i32, i32, i32) {
    %c0_i32 = arith.constant 0 : i32
    %c0_i32_0 = arith.constant 0 : i32
    return %arg0, %arg1, %c0_i32 : i32, i32, i32
  }
  func.func @transform_1(%arg0: i32, %arg1: i32) -> (i32, i32) {
    %c0_i32 = arith.constant 0 : i32
    %c0_i32_0 = arith.constant 0 : i32
    %c0_i32_1 = arith.constant 0 : i32
    return %c0_i32, %c0_i32_0 : i32, i32
  }
  func.func @transform_2(%arg0: i32, %arg1: i32) -> (i32, i32, i32) {
    %c0_i32 = arith.constant 0 : i32
    %c0_i32_0 = arith.constant 0 : i32
    return %arg0, %arg1, %c0_i32 : i32, i32, i32
  }
}

</mosaic_0001>

<bundles_post_ra>
// kernel: tpu_custom_call.1
= control target key start
LH: loop header
LB: loop body
LE: loop exit
PB: predicated region body
PF: predicated region fallthrough
CT: control target
= control target key end

     0   :  { %7 = vsyncpa [#allocation3], 0  ;;  %s1290_s0 = inlined_call_operand.hbm [shape: f32[2,128,128], index: 0, kind: input, shape index: {}]   ;;  %s1291_s1 = inlined_call_operand.hbm [shape: f32[128,128], index: 1, kind: input, shape index: {}]   ;;  %s1292_s2 = inlined_call_operand.hbm [shape: bf16[2,128,128], index: 2, kind: output, shape index: {}]  }
   0x1   :  { %9 = vsyncpa [#allocation3 + $0x1], 0 }
   0x2   :  { %10 = vsyncpa [#allocation6], 0 }
   0x3   :  { %11 = vsyncpa [#allocation4], 0 }
   0x4   :  { %13 = vsyncpa [#allocation4 + $0x1], 0  ;;  %s1046_s9 = smov 0   ;;  %s1048_s10 = smov 0  }
   0x5   :  { %s1050_s11 = smov 0   ;;  %s1052_s12 = smov 0  }
   0x6   :  { %s1054_s13 = smov 0   ;;  %s1056_s14 = smov 0  }
   0x7 LB: > { %s567_s15 = sadd.s32 4294967295, %s1022_s14   ;;  %s568_s16 = sadd.s32 4294967294, %s1022_s14   ;;  %s1022_s14 = sphi %s1056_s14, %s19_s14   ;;  %s1018_s13 = sphi %s1054_s13, %s1316_s13   ;;  %s1014_s12 = sphi %s1052_s12, %s1315_s12   ;;  %s1010_s11 = sphi %s1050_s11, %s1314_s11   ;;  %s1006_s10 = sphi %s1048_s10, %s1313_s10   ;;  %s1002_s9 = sphi %s1046_s9, %s1312_s9  }
   0x8   : > { %p53_p0 = scmp.ne.s32.totalorder %s1006_s10, %s1002_s9  ;;  %p1080_p1 = scmp.eq.s32.totalorder %s567_s15, 0 }
   0x9   : > { %p1084_p2 = scmp.eq.s32.totalorder %s567_s15, 1  ;;  %p106_p3 = scmp.eq.s32.totalorder %s568_s16, 1 }
   0xa   : > { %s1297_s17 = scalar_select %p1080_p1, 1, 0 }
   0xb   : > { %s1298_s18 = scalar_select %p1084_p2, 1, 0 }
   0xc   : > { %p1090_p4 = por %p1080_p1, %p53_p0  ;;  %p569_p5 = scmp.ge.s32.totalorder %s1022_s14, 1 }
   0xd   : > { %p1095_p6 = por %p106_p3, %p53_p0  ;;  %p113_p7 = scmp.lt.s32.totalorder %s1022_s14, 3 }
   0xe   : > { %s1299_s19 = scalar_select %p1090_p4, 1, 0 }
   0xf   : > { %s1300_s20 = scalar_select %p1095_p6, 1, 0 }
  0x10   : > { %p1100_p8 = pnand %p569_p5, %p113_p7  ;;  %s1024_s22 = smov [#allocation5]  }
  0x11   : > { %s125_s23 = sshll.u32 %s1024_s22, 4  ;;  %s31_s25 = sadd.s32 1, %s1018_s13  ;;  %s126_s23 = int_to_ptr.vmem [resolvable:$true] %s125_s23 }
  0x12   : > { %s1301_s21 = scalar_select %p1100_p8, 1, 0 }
  0x13   : > { %p809_p9 = pneg %p1100_p8  ;;  %s878_s28 = scalar_lea.hbm %s1291_s1, 2048 }
  0x14   : > { %p879_p12 = scmp.ne.s32.totalorder %s1291_s1, %s878_s28  ;;  %p885_p5 = scmp.lt.u32.totalorder %s878_s28, %s1291_s1 }
  0x15   : > { %p1109_p11 = pnand %p809_p9, %p1080_p1 }
  0x17   : > { %p880_p13 = pneg %p1109_p11 }
  0x19   : > { %p881_p0 = pnand %p880_p13, %p879_p12 }
  0x1b   : > { %p882_p3 = pneg %p881_p0 }
  0x1d   : > { %p887_p7 = pnand %p885_p5, %p882_p3 }
  0x1f   : > { %890 = shalt.err (!%p887_p7)
}
  0x20   : > { %s891_s5 = scalar_lea.vmem %s126_s23, 2048  ;;  %p899_p1 = scmp.lt.s32.totalorder %s126_s23, %s126_s23 }
  0x21   : > { %p892_p9 = scmp.ne.s32.totalorder %s126_s23, %s891_s5  ;;  %p900_p4 = scmp.lt.s32.totalorder %s891_s5, %s891_s5 }
  0x23   : > { %p894_p10 = pnand %p892_p9, %p880_p13  ;;  %p901_p8 = por %p900_p4, %p899_p1 }
  0x25   : > { %p895_p6 = pneg %p894_p10 }
  0x27   : > { %p902_p2 = pnand %p901_p8, %p895_p6 }
  0x29   : > { %905 = shalt.err (!%p902_p2)
}
  0x2a   : > { %s1025_s6 = smov 128   ;;  %s1026_s7 = smov 8  }
  0x2b   : > { %812 = dma.hbm_to_vmem [thread:$0]  (!%p1109_p11), %s1291_s1, 2048, %s126_s23, [#allocation6], %s1025_s6, %s1025_s6, %s1026_s7  }
  0x2c   : > { %p33_p1 = scmp.ge.s32.totalorder %s31_s25, 2  ;;  %s40_s16 = sadd.s32 1, %s1010_s11 }
  0x2d   : > { %p47_p2 = scmp.ne.s32.totalorder %s1010_s11, %s1006_s10  ;;  %p48_p4 = scmp.eq.s32.totalorder %s1022_s14, 0 }
  0x2e   : > { %s1318_s25 = smov (%p33_p1, %s31_s25), 0  ;;  %p1304_p8 = scmp.ne.s32.totalorder %s1298_s18, 0 }
  0x2f   : > { %p1139_p6 = por %p48_p4, %p47_p2  ;;  %s35_s26 = ssub.s32 %s1018_s13, %s1318_s25 }
  0x30   : > { %p1145_p10 = por %p1304_p8, %p47_p2  ;;  %p822_p12 = scmp.lt.s32.totalorder %s1022_s14, 2 }
  0x31   : > { %p38_p11 = scmp.eq.s32.totalorder %s35_s26, 0  ;;  %s139_s23 = sand.u32 1, %s1010_s11  }
  0x32   : > { %s572_s27 = sshll.u32 %s139_s23, 7  ;;  %s600_s29 = sshll.u32 %s1018_s13, 11 }
  0x33   : > { %s1154_s28 = scalar_select %p38_p11, %s1010_s11, %s40_s16  }
  0x34   : > { %s1160_s4 = scalar_lea.hbm %s1290_s0, %s600_s29  ;;  %s143_s18 = scalar_lea.vmem [#allocation2], %s572_s27 }
  0x35   : > { %s152_s5 = sshll.u32 %s143_s18, 4  ;;  %p1166_p13 = pnand %p822_p12, %p1139_p6  ;;  %s1162_s5 = int_to_ptr.vmem [resolvable:$true] %s152_s5 }
  0x36   : > { %s1170_s15 = scalar_lea.sflag [#allocation3], %s139_s23  ;;  %s906_s16 = scalar_lea.hbm %s1160_s4, 2048 }
  0x37   : > { %p907_p0 = scmp.ne.s32.totalorder %s1160_s4, %s906_s16  ;;  %p908_p3 = pneg %p1166_p13 }
  0x38   : > { %s911_s22 = scalar_lea.hbm %s1290_s0, 4096  ;;  %p912_p9 = scmp.lt.u32.totalorder %s1160_s4, %s1290_s0 }
  0x39   : > { %p909_p5 = pnand %p908_p3, %p907_p0  ;;  %p913_p1 = scmp.lt.u32.totalorder %s911_s22, %s906_s16 }
  0x3a   : > { %p915_p4 = scmp.lt.u32.totalorder %s906_s16, %s1160_s4 }
  0x3b   : > { %p910_p7 = pneg %p909_p5  ;;  %p914_p2 = por %p913_p1, %p912_p9 }
  0x3d   : > { %p916_p6 = por %p915_p4, %p914_p2 }
  0x3f   : > { %p917_p8 = pnand %p916_p6, %p910_p7 }
  0x41   : > { %920 = shalt.err (!%p917_p8)
}
  0x42   : > { %s921_s23 = scalar_lea.vmem %s1162_s5, 2048  ;;  %s1027_s3 = smov [#allocation2]  }
  0x43   : > { %p922_p12 = scmp.ne.s32.totalorder %s1162_s5, %s921_s23  ;;  %s926_s18 = sshll.u32 %s1027_s3, 4  ;;  %s927_s18 = int_to_ptr.vmem [resolvable:$false] %s926_s18 }
  0x44   : > { %s928_s26 = scalar_lea.vmem %s927_s18, 4096  ;;  %p929_p5 = scmp.lt.s32.totalorder %s1162_s5, %s927_s18 }
  0x45   : > { %p924_p11 = pnand %p922_p12, %p908_p3  ;;  %p930_p9 = scmp.lt.s32.totalorder %s928_s26, %s921_s23 }
  0x47   : > { %p925_p0 = pneg %p924_p11  ;;  %p931_p1 = por %p930_p9, %p929_p5 }
  0x49   : > { %p932_p2 = pnand %p931_p1, %p925_p0 }
  0x4b   : > { %935 = shalt.err (!%p932_p2)
}
  0x4c   : > { %816 = dma.hbm_to_vmem [thread:$0]  (!%p1166_p13), %s1160_s4, 2048, %s1162_s5, %s1170_s15, %s1025_s6, %s1025_s6, %s1026_s7  }
  0x4d   : > { %p1307_p3 = scmp.ne.s32.totalorder %s1301_s21, 0 }
  0x4e   : > { %s1204_s16 = sand.u32 (!%p1307_p3), 1, %s1006_s10   ;;  %p1308_p7 = scmp.ne.s32.totalorder (!%p1307_p3), %s1299_s19, 0 }
  0x4f   : > { %164 = sbr.rel (%p1307_p3) target bundleno = 367 (0x16f), region = 28  ;;  %s576_s27 = sshll.u32 (!%p1307_p3), %s1204_s16, 7 }
  0x50   : > { %s167_s22 = scalar_lea.sflag (!%p1307_p3), [#allocation3], %s1204_s16  ;;  %s1208_s29 = scalar_lea.vmem (!%p1307_p3), [#allocation2], %s576_s27 }
  0x56   : > { %989 = dma.done.wait (%p1308_p7), %s167_s22, 2048  }
  0x57   : > { %991 = vsyncadd (%p1308_p7), %s167_s22, 4294965248  ;;  %p1309_p13 = scmp.ne.s32.totalorder %s1297_s17, 0 }
  0x59   : > { %993 = dma.done.wait (%p1309_p13), [#allocation6], 2048  }
  0x5a   : > { %995 = vsyncadd (%p1309_p13), [#allocation6], 4294965248  ;;  %v213_v0 = vld [vmem:[#allocation5] sm:$0xff]  ;;  %v214_v1 = vld [vmem:[#allocation5 + $0x8] sm:$0xff]  ;;  %s578_s17 = sshll.u32 %s1204_s16, 6  ;;  %s617_s6 = sshll.u32 %s1014_s12, 10 }
  0x5b   : > { %v215_v2 = vld [vmem:[#allocation5 + $0x10] sm:$0xff]  ;;  %v753_v3 = vpack.c.bf16 %v214_v1, %v213_v0  ;;  %v216_v4 = vld [vmem:[#allocation5 + $0x18] sm:$0xff]  ;;  %v217_v6 = vld [vmem:[#allocation5 + $0x20] sm:$0xff]  ;;  %s194_s19 = scalar_lea.vmem [#allocation7], %s578_s17  ;;  %s1241_s5 = scalar_lea.hbm %s1292_s2, %s617_s6 }
  0x5c   : > { %v757_v5 = vpack.c.bf16 %v216_v4, %v215_v2  ;;  %v218_v7 = vld [vmem:[#allocation5 + $0x28] sm:$0xff]  ;;  %v197_v9 = vld [vmem:[%s1208_s29] sm:$0xff]  ;;  %v219_v11 = vld [vmem:[#allocation5 + $0x30] sm:$0xff]  ;;  %s470_s21 = sshll.u32 %s194_s19, 4  ;;  %s455_s12 = scalar_lea.sflag [#allocation4], %s1204_s16  ;;  %s1236_s21 = int_to_ptr.vmem [resolvable:$true] %s470_s21 }
  0x5d   : > { %754 = vmatprep.subr.bf16.mxu0 %v753_v3  ;;  %785 = vmatprep.subr.bf16.mxu1 %v753_v3  ;;  %v761_v8 = vpack.c.bf16 %v218_v7, %v217_v6  ;;  %v205_v10 = vld [vmem:[%s1208_s29 + $0x40] sm:$0xff]  ;;  %v220_v12 = vld [vmem:[#allocation5 + $0x38] sm:$0xff]  ;;  %v222_v15 = vld [vmem:[#allocation5 + $0x48] sm:$0xff]  ;;  %s936_s8 = scalar_lea.vmem %s1236_s21, 1024  ;;  %s1028_s15 = smov [#allocation7]  }
  0x5e   : > { %756 = vmatpush3.bf16.msra.mxu0 %v753_v3  ;;  %793 = vmatpush3.bf16.msra.mxu1 %v753_v3  ;;  %v765_v13 = vpack.c.bf16 %v220_v12, %v219_v11  ;;  %v221_v14 = vld [vmem:[#allocation5 + $0x40] sm:$0xff]  ;;  %v223_v17 = vld [vmem:[#allocation5 + $0x50] sm:$0xff]  ;;  %v224_v18 = vld [vmem:[#allocation5 + $0x58] sm:$0xff]  ;;  %p937_p4 = scmp.ne.s32.totalorder %s1236_s21, %s936_s8  ;;  %s940_s30 = sshll.u32 %s1028_s15, 4  ;;  %s941_s30 = int_to_ptr.vmem [resolvable:$false] %s940_s30 }
  0x5f   : > { %758 = vmatprep.subr.bf16.mxu0 %v757_v5  ;;  %786 = vmatprep.subr.bf16.mxu1 %v757_v5  ;;  %v769_v16 = vpack.c.bf16 %v222_v15, %v221_v14  ;;  %v773_v19 = vpack.c.bf16 %v224_v18, %v223_v17  ;;  %v225_v20 = vld [vmem:[#allocation5 + $0x60] sm:$0xff]  ;;  %v226_v21 = vld [vmem:[#allocation5 + $0x68] sm:$0xff]  ;;  %v227_v23 = vld [vmem:[#allocation5 + $0x70] sm:$0xff]  ;;  %s942_s23 = scalar_lea.vmem %s941_s30, 2048  ;;  %p943_p12 = scmp.lt.s32.totalorder %s1236_s21, %s941_s30 }
  0x60   : > { %729 = vmatprep.mubr.f32.mxu0 %v197_v9  ;;  %741 = vmatprep.mubr.f32.mxu1 %v205_v10  ;;  %v777_v22 = vpack.c.bf16 %v226_v21, %v225_v20  ;;  %v228_v24 = vld [vmem:[#allocation5 + $0x78] sm:$0xff]  ;;  %v198_v26 = vld [vmem:[%s1208_s29 + $0x8] sm:$0xff]  ;;  %v199_v28 = vld [vmem:[%s1208_s29 + $0x10] sm:$0xff]  ;;  %p938_p6 = pnand %p937_p4, %p1145_p10  ;;  %p944_p11 = scmp.lt.s32.totalorder %s942_s23, %s936_s8 }
  0x61   : > { %v781_v25 = vpack.c.bf16 %v228_v24, %v227_v23  ;;  %v206_v27 = vld [vmem:[%s1208_s29 + $0x48] sm:$0xff]  ;;  %v207_v29 = vld [vmem:[%s1208_s29 + $0x50] sm:$0xff]  ;;  %v200_v30 = vld [vmem:[%s1208_s29 + $0x18] sm:$0xff] }
  0x62   : > { %760 = vmatpush3.bf16.msra.mxu0 %v757_v5  ;;  %794 = vmatpush3.bf16.msra.mxu1 %v757_v5  ;;  %v208_v31 = vld [vmem:[%s1208_s29 + $0x58] sm:$0xff]  ;;  %v201_v32 = vld [vmem:[%s1208_s29 + $0x20] sm:$0xff]  ;;  %v202_v34 = vld [vmem:[%s1208_s29 + $0x28] sm:$0xff]  ;;  %p939_p8 = pneg %p938_p6  ;;  %p945_p0 = por %p944_p11, %p943_p12 }
  0x63   : > { %762 = vmatprep.subr.bf16.mxu0 %v761_v8  ;;  %787 = vmatprep.subr.bf16.mxu1 %v761_v8  ;;  %v209_v33 = vld [vmem:[%s1208_s29 + $0x60] sm:$0xff]  ;;  %v210_v35 = vld [vmem:[%s1208_s29 + $0x68] sm:$0xff]  ;;  %v203_v36 = vld [vmem:[%s1208_s29 + $0x30] sm:$0xff] }
  0x64   : > { %v211_v37 = vld [vmem:[%s1208_s29 + $0x70] sm:$0xff]  ;;  %v204_v38 = vld [vmem:[%s1208_s29 + $0x38] sm:$0xff]  ;;  %p946_p5 = pnand %p945_p0, %p939_p8 }
  0x65   : > { %v212_v39 = vld [vmem:[%s1208_s29 + $0x78] sm:$0xff] }
  0x66   : > { %764 = vmatpush3.bf16.msra.mxu0 %v761_v8  ;;  %795 = vmatpush3.bf16.msra.mxu1 %v761_v8 }
  0x67   : > { %766 = vmatprep.subr.bf16.mxu0 %v765_v13  ;;  %788 = vmatprep.subr.bf16.mxu1 %v765_v13 }
  0x6a   : > { %768 = vmatpush3.bf16.msra.mxu0 %v765_v13  ;;  %796 = vmatpush3.bf16.msra.mxu1 %v765_v13 }
  0x6b   : > { %770 = vmatprep.subr.bf16.mxu0 %v769_v16  ;;  %789 = vmatprep.subr.bf16.mxu1 %v769_v16 }
  0x6e   : > { %772 = vmatpush3.bf16.msra.mxu0 %v769_v16  ;;  %797 = vmatpush3.bf16.msra.mxu1 %v769_v16 }
  0x6f   : > { %774 = vmatprep.subr.bf16.mxu0 %v773_v19  ;;  %790 = vmatprep.subr.bf16.mxu1 %v773_v19 }
  0x72   : > { %776 = vmatpush3.bf16.msra.mxu0 %v773_v19  ;;  %798 = vmatpush3.bf16.msra.mxu1 %v773_v19 }
  0x73   : > { %778 = vmatprep.subr.bf16.mxu0 %v777_v22  ;;  %791 = vmatprep.subr.bf16.mxu1 %v777_v22 }
  0x76   : > { %780 = vmatpush3.bf16.msra.mxu0 %v777_v22  ;;  %799 = vmatpush3.bf16.msra.mxu1 %v777_v22 }
  0x77   : > { %782 = vmatprep.subr.bf16.mxu0 %v781_v25  ;;  %792 = vmatprep.subr.bf16.mxu1 %v781_v25 }
  0x7a   : > { %784 = vmatpush3.bf16.msra.mxu0 %v781_v25  ;;  %800 = vmatpush3.bf16.msra.mxu1 %v781_v25 }
  0x7d   : > { %730 = vmatmul.mubr.f32.vlgmr.msra.gmra.mrb[0].mxu0 %v198_v26  ;;  %742 = vmatmul.mubr.f32.vlgmr.msra.gmra.mrb[0].mxu1 %v206_v27 }
  0x7e   : > { %732 = vmatprep.mubr.f32.mxu0 %v199_v28  ;;  %744 = vmatprep.mubr.f32.mxu1 %v207_v29 }
  0x81   : > { %733 = vmatmul.mubr.f32.gmra.mrb[2].mxu0 %v200_v30  ;;  %745 = vmatmul.mubr.f32.gmra.mrb[2].mxu1 %v208_v31 }
  0x82   : > { %735 = vmatprep.mubr.f32.mxu0 %v201_v32  ;;  %747 = vmatprep.mubr.f32.mxu1 %v209_v33 }
  0x85   : > { %736 = vmatmul.mubr.f32.gmra.mrb[4].mxu0 %v202_v34  ;;  %748 = vmatmul.mubr.f32.gmra.mrb[4].mxu1 %v210_v35 }
  0x86   : > { %738 = vmatprep.mubr.f32.mxu0 %v203_v36  ;;  %750 = vmatprep.mubr.f32.mxu1 %v211_v37 }
  0x89   : > { %739 = vmatmul.mubr.f32.gmra.mrb[6].mxu0 %v204_v38  ;;  %751 = vmatmul.mubr.f32.gmra.mrb[6].mxu1 %v212_v39 }
 0x150   : > { %v731_v40 = vpop.f32.mrb[0].mxu0  ;;  %v743_v41 = vpop.f32.mrb[0].mxu1 }
 0x151   : > { %v295_v42 = vpop.f32.mrb[1].mxu0  ;;  %v335_v43 = vpop.f32.mrb[1].mxu1 }
 0x152   : > { %v621_v44 = vpack.c.bf16 %v731_v40, %v295_v42  ;;  %v641_v45 = vpack.c.bf16 %v743_v41, %v335_v43 }
 0x154   : > { %622 = vst [vmem:[%s194_s19] sm:$0xff] %v621_v44   ;;  %661 = vst [vmem:[%s194_s19 + $0x20] sm:$0xff] %v641_v45   ;;  %v734_v46 = vpop.f32.mrb[2].mxu0  ;;  %v746_v47 = vpop.f32.mrb[2].mxu1 }
 0x155   : > { %v305_v48 = vpop.f32.mrb[3].mxu0  ;;  %v345_v49 = vpop.f32.mrb[3].mxu1 }
 0x156   : > { %v626_v50 = vpack.c.bf16 %v734_v46, %v305_v48  ;;  %v646_v51 = vpack.c.bf16 %v746_v47, %v345_v49 }
 0x158   : > { %658 = vst [vmem:[%s194_s19 + $0x8] sm:$0xff] %v626_v50   ;;  %662 = vst [vmem:[%s194_s19 + $0x28] sm:$0xff] %v646_v51   ;;  %v737_v52 = vpop.f32.mrb[4].mxu0  ;;  %v749_v53 = vpop.f32.mrb[4].mxu1 }
 0x159   : > { %v315_v54 = vpop.f32.mrb[5].mxu0  ;;  %v355_v55 = vpop.f32.mrb[5].mxu1 }
 0x15a   : > { %v631_v56 = vpack.c.bf16 %v737_v52, %v315_v54  ;;  %v651_v57 = vpack.c.bf16 %v749_v53, %v355_v55 }
 0x15c   : > { %659 = vst [vmem:[%s194_s19 + $0x10] sm:$0xff] %v631_v56   ;;  %663 = vst [vmem:[%s194_s19 + $0x30] sm:$0xff] %v651_v57   ;;  %v740_v58 = vpop.f32.mrb[6].mxu0  ;;  %v752_v59 = vpop.f32.mrb[6].mxu1 }
 0x15d   : > { %v325_v60 = vpop.f32.mrb[7].mxu0  ;;  %v365_v61 = vpop.f32.mrb[7].mxu1 }
 0x15e   : > { %v636_v62 = vpack.c.bf16 %v740_v58, %v325_v60  ;;  %v656_v63 = vpack.c.bf16 %v752_v59, %v365_v61 }
 0x160   : > { %660 = vst [vmem:[%s194_s19 + $0x18] sm:$0xff] %v636_v62   ;;  %664 = vst [vmem:[%s194_s19 + $0x38] sm:$0xff] %v656_v63  }
 0x161   : > { %949 = shalt.err (!%p946_p5)
}
 0x162   : > { %s950_s3 = scalar_lea.hbm %s1241_s5, 1024  ;;  %s954_s27 = scalar_lea.hbm %s1292_s2, 2048 }
 0x163   : > { %p951_p9 = scmp.ne.s32.totalorder %s1241_s5, %s950_s3  ;;  %p955_p3 = scmp.lt.u32.totalorder %s1241_s5, %s1292_s2 }
 0x164   : > { %p956_p7 = scmp.lt.u32.totalorder %s954_s27, %s950_s3  ;;  %p958_p4 = scmp.lt.u32.totalorder %s950_s3, %s1241_s5 }
 0x165   : > { %p952_p1 = pnand %p951_p9, %p1145_p10 }
 0x166   : > { %p957_p13 = por %p956_p7, %p955_p3 }
 0x167   : > { %p953_p2 = pneg %p952_p1 }
 0x168   : > { %p959_p6 = por %p958_p4, %p957_p13 }
 0x16a   : > { %p960_p8 = pnand %p959_p6, %p953_p2 }
 0x16c   : > { %963 = shalt.err (!%p960_p8)
}
 0x16d   : > { %s1029_s17 = smov 64   ;;  %s1030_s19 = smov 4  }
 0x16e   : > { %807 = dma.vmem_to_hbm [thread:$0]  (%p1145_p10), %s1236_s21, 1024, %s1241_s5, %s455_s12, %s1029_s17, %s1029_s17, %s1030_s19  }
 0x16f PF: > { %s485_s6 = sand.u32 1, %s1002_s9   ;;  %p1310_p12 = scmp.ne.s32.totalorder %s1300_s20, 0 }
 0x170   : > { %p1311_p11 = scmp.ge.s32.totalorder %s1022_s14, 2  ;;  %s486_s7 = scalar_lea.sflag [#allocation4], %s485_s6 }
 0x172   : > { %p818_p0 = pnand %p1311_p11, %p1310_p12 }
 0x174   : > { %997 = dma.done.wait (!%p818_p0), %s486_s7, 1024  }
 0x175   : > { %999 = vsyncadd (!%p818_p0), %s486_s7, 4294966272  ;;  %s19_s14 = sadd.s32 1, %s1022_s14   ;;  %s1312_s9 = smov %s1006_s10 }
 0x176   : > { %p16_p5 = scmp.ge.s32.totalorder %s19_s14, 4   ;;  %s1313_s10 = smov %s1010_s11 }
 0x177   : > { %s1314_s11 = smov %s1154_s28  ;;  %s1315_s12 = smov %s1018_s13 }
 0x178   : > { %s1316_s13 = smov %s1318_s25  ;;  %18 = sbr.rel (!%p16_p5) target bundleno = 7 (0x7), region = 77 }
 0x17f   :  { %491 = vsyncpa [#allocation3], 1 }
 0x180   :  { %493 = vsyncpa [#allocation3 + $0x1], 1 }
 0x181   :  { %494 = vsyncpa [#allocation6], 1 }
 0x182   :  { %495 = vsyncpa [#allocation4], 1 }
 0x183   :  { %497 = vsyncpa [#allocation4 + $0x1], 1 }

</bundles_post_ra>
